<compile_context>
chip_gen: v5e
topology: v5e:2x2
jax: 0.10.0
libtpu: 0.0.40
codegen_flags: <defaults>
</compile_context>

<pallas_src>
import functools

import jax
import jax.numpy as jnp
from jax.experimental import pallas as pl
from jax.experimental.pallas import tpu as pltpu


def _round_up(x: int, m: int) -> int:
    return ((x + m - 1) // m) * m


def _cdiv(a: int, b: int) -> int:
    return (a + b - 1) // b


def _concat_linear_kernel_single(x_ref, w_ref, b_ref, o_ref):
    # x_ref: (tm, K)  w_ref: (tn, K)  b_ref: (1, tn)  o_ref: (tm, tn)
    acc = jax.lax.dot_general(
        x_ref[...],
        w_ref[...],
        dimension_numbers=(((1,), (1,)), ((), ())),  # NT: contract trailing K
        preferred_element_type=jnp.float32,
    )
    o_ref[...] = (acc + b_ref[...].astype(jnp.float32)).astype(o_ref.dtype)


def _concat_linear_kernel_multik(x_ref, w_ref, b_ref, o_ref, acc_ref):
    # x_ref: (tm, tk)  w_ref: (tn, tk)  b_ref: (1, tn)  o_ref: (tm, tn)
    # acc_ref: (tm, tn) f32 scratch accumulator, resident across the K axis.
    k = pl.program_id(2)

    @pl.when(k == 0)
    def _():
        # Initialise the accumulator with the bias -> epilogue is a bare store.
        acc_ref[...] = jnp.broadcast_to(
            b_ref[...].astype(jnp.float32), acc_ref.shape
        )

    acc_ref[...] += jax.lax.dot_general(
        x_ref[...],
        w_ref[...],
        dimension_numbers=(((1,), (1,)), ((), ())),  # NT: no XLU transpose
        preferred_element_type=jnp.float32,
    )

    @pl.when(k == pl.num_programs(2) - 1)
    def _():
        o_ref[...] = acc_ref[...].astype(o_ref.dtype)


@functools.partial(
    jax.jit,
    static_argnames=("tm", "tn", "tk", "single_pass_k_bytes", "out_dtype"),
)
def _fused_concat_linear_2d(x2d, w2d, b2d, *, tm, tn, tk,
                            single_pass_k_bytes, out_dtype):
    """One tiled matmul: (M, K) x (N_total, K)^T + bias -> (M, N_total)."""
    M, K = x2d.shape
    N, Kw = w2d.shape
    assert K == Kw
    in_bytes = x2d.dtype.itemsize
    out_bytes = jnp.dtype(out_dtype).itemsize

    # ---- tile selection ------------------------------------------------
    tm_ = min(tm, _round_up(M, 8))
    grid_m = _cdiv(M, tm_)

    Np128 = _round_up(N, 128)
    tn_ = min(tn, Np128)
    # v7x megacore: keep the "parallel" grid at >= 2 blocks when M collapses.
    if grid_m == 1 and tn_ >= Np128 and Np128 >= 256:
        tn_ = _round_up(Np128 // 2, 128)
    grid_n = _cdiv(N, tn_)

    single_pass = K * in_bytes <= single_pass_k_bytes

    if single_pass:
        # K fits one VMEM tile: 2-D grid, no accumulator, no K padding.
        tk_ = K
        grid_k = 1
        grid = (grid_m, grid_n)
        kernel = _concat_linear_kernel_single
        in_specs = [
            pl.BlockSpec((tm_, tk_), lambda i, j: (i, 0)),
            pl.BlockSpec((tn_, tk_), lambda i, j: (j, 0)),
            pl.BlockSpec((1, tn_), lambda i, j: (0, j)),
        ]
        out_spec = pl.BlockSpec((tm_, tn_), lambda i, j: (i, j))
        scratch = []
        semantics = ("parallel", "parallel")
        w_buffers = 2
    else:
        tk_ = min(tk, _round_up(K, 128))
        Kp = _round_up(K, tk_)
        if Kp != K:
            # Zero-pad K only (required for reduction correctness).
            x2d = jnp.pad(x2d, ((0, 0), (0, Kp - K)))
            w2d = jnp.pad(w2d, ((0, 0), (0, Kp - K)))
        grid_k = Kp // tk_
        grid = (grid_m, grid_n, grid_k)
        kernel = _concat_linear_kernel_multik

        # Decode-like shapes (M-grid == 1) are weight-streaming bound on v5e:
        # deepen the weight pipeline.
        w_buffers = 3 if (grid_m == 1 and grid_k > 1) else 2
        if w_buffers == 3:
            w_spec = pl.BlockSpec((tn_, tk_), lambda i, j, k: (j, k),
                                  pipeline_mode=pl.Buffered(3))
        else:
            w_spec = pl.BlockSpec((tn_, tk_), lambda i, j, k: (j, k))

        in_specs = [
            pl.BlockSpec((tm_, tk_), lambda i, j, k: (i, k)),
            w_spec,
            pl.BlockSpec((1, tn_), lambda i, j, k: (0, j)),
        ]
        out_spec = pl.BlockSpec((tm_, tn_), lambda i, j, k: (i, j))
        scratch = [pltpu.VMEM((tm_, tn_), jnp.float32)]
        semantics = ("parallel", "parallel", "arbitrary")

    # ---- explicit scoped-VMEM budget (v5e default is only 16 MiB) -------
    vmem_bytes = (
        2 * tm_ * tk_ * in_bytes          # x double buffer
        + w_buffers * tn_ * tk_ * in_bytes  # weight buffers
        + 2 * tm_ * tn_ * out_bytes         # output double buffer
        + 2 * tn_ * b2d.dtype.itemsize      # bias
    )
    if not single_pass:
        vmem_bytes += tm_ * tn_ * 4         # f32 accumulator scratch
    # 1.5x headroom for internal scratch; cap under v7x's 64 MiB physical VMEM.
    vmem_limit = min(max(32 << 20, int(vmem_bytes * 1.5) + (4 << 20)), 56 << 20)

    return pl.pallas_call(
        kernel,
        out_shape=jax.ShapeDtypeStruct((M, N), out_dtype),
        grid_spec=pltpu.PrefetchScalarGridSpec(
            num_scalar_prefetch=0,
            grid=grid,
            in_specs=in_specs,
            out_specs=out_spec,
            scratch_shapes=scratch,
        ),
        compiler_params=pltpu.CompilerParams(
            dimension_semantics=semantics,
            vmem_limit_bytes=vmem_limit,
        ),
    )(x2d, w2d, b2d)


def ipex_concat_linear_forward(x, weights, biases, *, tm=512, tn=512, tk=1024,
                               compute_dtype=jnp.bfloat16,
                               single_pass_k_bytes=8192):
    """Pallas equivalent of _IPEXConcatLinearCPU.forward (fallback fp path).

    Args:
      x:       (batch, seq, in_features)
      weights: (num_concat, out_features, in_features)
      biases:  (num_concat, out_features)
      compute_dtype: MXU operand dtype (default bf16, f32 accumulate);
                     None keeps the input dtype.

    Returns:
      tuple of num_concat arrays, each (batch, seq, out_features)
    """
    batch, seq, in_features = x.shape
    num_concat, out_features, in_features_w = weights.shape
    assert in_features == in_features_w
    assert biases.shape == (num_concat, out_features)

    out_dtype = jnp.dtype(x.dtype)
    M = batch * seq
    N = num_concat * out_features

    x2d = x.reshape(M, in_features)
    w2d = weights.reshape(N, in_features)   # concat along the output axis
    b2d = biases.reshape(1, N)

    if compute_dtype is not None:
        x2d = x2d.astype(compute_dtype)
        w2d = w2d.astype(compute_dtype)

    out2d = _fused_concat_linear_2d(
        x2d, w2d, b2d, tm=tm, tn=tn, tk=tk,
        single_pass_k_bytes=single_pass_k_bytes, out_dtype=out_dtype)

    return tuple(
        out2d[:, i * out_features:(i + 1) * out_features].reshape(
            batch, seq, out_features)
        for i in range(num_concat)
    )


def _reference(x, weights, biases):
    outs = []
    for i in range(weights.shape[0]):
        y = jnp.einsum("bsk,ok->bso", x, weights[i]) + biases[i]
        outs.append(y)
    return tuple(outs)


if __name__ == "__main__":
    key = jax.random.PRNGKey(0)
    kx, kw, kb, kx2, kw2, kb2 = jax.random.split(key, 6)

    # ---- Test 1: small QKV-style shapes -> single-pass (2-D grid) path ----
    num_concat, batch, seq, hidden, out_features = 3, 2, 8, 32, 32
    x = jax.random.normal(kx, (batch, seq, hidden), dtype=jnp.float32)
    weights = jax.random.normal(
        kw, (num_concat, out_features, hidden), dtype=jnp.float32
    ) * (1.0 / jnp.sqrt(hidden))
    biases = jax.random.normal(
        kb, (num_concat, out_features), dtype=jnp.float32) * 0.01

    outs = jax.block_until_ready(ipex_concat_linear_forward(x, weights, biases))
    refs = _reference(x, weights, biases)
    for o, r in zip(outs, refs):
        assert o.shape == (batch, seq, out_features)
        # bf16 MXU operands (f32 accumulate) -> loose tolerance vs f32 ref.
        assert jnp.allclose(o, r, atol=5e-2, rtol=5e-2), float(
            jnp.max(jnp.abs(o - r)))

    # ---- Test 2: decode-like shape forced through the multi-K (3-D) path ----
    # Exercises the f32 accumulator, bias-init epilogue, megacore N split and
    # the Buffered(3) weight pipeline (grid_m == 1, grid_k > 1).
    nc2, b2_, s2, hid2, of2 = 3, 2, 8, 1024, 128
    x2 = jax.random.normal(kx2, (b2_, s2, hid2), dtype=jnp.float32)
    w2 = jax.random.normal(
        kw2, (nc2, of2, hid2), dtype=jnp.float32) * (1.0 / jnp.sqrt(hid2))
    bias2 = jax.random.normal(kb2, (nc2, of2), dtype=jnp.float32) * 0.01

    outs2 = jax.block_until_ready(
        ipex_concat_linear_forward(x2, w2, bias2, tk=256, single_pass_k_bytes=0))
    refs2 = _reference(x2, w2, bias2)
    for o, r in zip(outs2, refs2):
        assert o.shape == (b2_, s2, of2)
        assert jnp.allclose(o, r, atol=5e-2, rtol=5e-2), float(
            jnp.max(jnp.abs(o - r)))

    print("KERNEL_OK")
</pallas_src>

<mosaic_0001>
module attributes {stable_mosaic.version = 11 : i64} {
  func.func @_concat_linear_kernel_single(%arg0: i32, %arg1: i32, %arg2: memref<16x32xbf16, #tpu.memory_space<vmem>>, %arg3: memref<128x32xbf16, #tpu.memory_space<vmem>>, %arg4: memref<1x128xf32, #tpu.memory_space<vmem>>, %arg5: memref<16x128xf32, #tpu.memory_space<vmem>>) attributes {dimension_semantics = [#tpu.dimension_semantics<parallel>, #tpu.dimension_semantics<parallel>], iteration_bounds = array<i64: 1, 1>, scalar_prefetch = 0 : i64, scratch_operands = 0 : i64, tpu.core_type = #tpu.core_type<tc>, window_params = [{transform_indices = @transform_0, window_bounds = array<i64: 16, 32>}, {transform_indices = @transform_1, window_bounds = array<i64: 128, 32>}, {transform_indices = @transform_2, window_bounds = array<i64: 1, 128>}, {transform_indices = @transform_3, window_bounds = array<i64: 16, 128>}]} {
    %c0 = arith.constant 0 : index
    %c0_0 = arith.constant 0 : index
    %0 = vector.load %arg2[%c0, %c0_0] : memref<16x32xbf16, #tpu.memory_space<vmem>>, vector<16x32xbf16>
    %c0_1 = arith.constant 0 : index
    %c0_2 = arith.constant 0 : index
    %1 = vector.load %arg3[%c0_1, %c0_2] : memref<128x32xbf16, #tpu.memory_space<vmem>>, vector<128x32xbf16>
    %cst = arith.constant dense<0.000000e+00> : vector<16x128xf32>
    %2 = tpu.matmul %0, %1, %cst {dimension_numbers = #tpu.dot_dimension_numbers<[1], [1], [0], [0], [0, 0, 1, 0], [], []>} : vector<16x32xbf16>, vector<128x32xbf16>, vector<16x128xf32> -> vector<16x128xf32>
    %c0_3 = arith.constant 0 : index
    %c0_4 = arith.constant 0 : index
    %3 = vector.load %arg4[%c0_3, %c0_4] : memref<1x128xf32, #tpu.memory_space<vmem>>, vector<1x128xf32>
    %4 = vector.broadcast %3 : vector<1x128xf32> to vector<16x128xf32>
    %5 = arith.addf %2, %4 : vector<16x128xf32>
    %c0_5 = arith.constant 0 : index
    %c0_6 = arith.constant 0 : index
    %6 = vector.load %arg5[%c0_5, %c0_6] : memref<16x128xf32, #tpu.memory_space<vmem>>, vector<16x128xf32>
    tpu.vector_store %arg5[%c0_5, %c0_6], %5 {strides = array<i32>} : memref<16x128xf32, #tpu.memory_space<vmem>>, vector<16x128xf32>,
    return
  }
  func.func @transform_0(%arg0: i32, %arg1: i32) -> (i32, i32) {
    %c0_i32 = arith.constant 0 : i32
    %c0_i32_0 = arith.constant 0 : i32
    return %arg0, %c0_i32 : i32, i32
  }
  func.func @transform_1(%arg0: i32, %arg1: i32) -> (i32, i32) {
    %c0_i32 = arith.constant 0 : i32
    %c0_i32_0 = arith.constant 0 : i32
    return %arg1, %c0_i32 : i32, i32
  }
  func.func @transform_2(%arg0: i32, %arg1: i32) -> (i32, i32) {
    %c0_i32 = arith.constant 0 : i32
    %c0_i32_0 = arith.constant 0 : i32
    return %c0_i32, %arg1 : i32, i32
  }
  func.func @transform_3(%arg0: i32, %arg1: i32) -> (i32, i32) {
    %c0_i32 = arith.constant 0 : i32
    return %arg0, %arg1 : i32, i32
  }
}

</mosaic_0001>

<bundles_post_ra>
// kernel: _fused_concat_linear_2d.1
= control target key start
LH: loop header
LB: loop body
LE: loop exit
PB: predicated region body
PF: predicated region fallthrough
CT: control target
= control target key end

     0   :  { %vm82_vm0 = vcmask 261120   ;;  %s285_s0 = inlined_call_operand.vmem [shape: bf16[16,32], index: 0, kind: input, shape index: {}]   ;;  %s286_s1 = inlined_call_operand.vmem [shape: bf16[96,32], index: 1, kind: input, shape index: {}]   ;;  %s287_s2 = inlined_call_operand.vmem [shape: f32[1,96], index: 2, kind: input, shape index: {}]   ;;  %s288_s3 = inlined_call_operand.hbm [shape: f32[16,96], index: 3, kind: output, shape index: {}]  }
   0x1   :  { %v189_v0 = vld [vmem:[%s286_s1 + $0x38] sm:$0xff] }
   0x2   :  { %v108_v1 = vsel %vm82_vm0, %v189_v0, 0 }
   0x3   :  { %8 = vsyncpa [#allocation3], 0  ;;  %110 = vmatpush.bf16.xpose.msra.mxu0 %v108_v1  ;;  %v188_v2 = vld [vmem:[%s286_s1 + $0x30] sm:$0xff]  ;;  %v187_v4 = vld [vmem:[%s286_s1 + $0x28] sm:$0xff]  ;;  %s220_s5 = smov [#allocation2]   ;;  %s132_s8 = sshll.u32 %s288_s3, 4  ;;  %s133_s8 = int_to_ptr.hbm [resolvable:$true] %s132_s8 }
   0x4   :  { %v105_v3 = vsel %vm82_vm0, %v188_v2, 0  ;;  %v102_v5 = vsel %vm82_vm0, %v187_v4, 0  ;;  %v186_v6 = vld [vmem:[%s286_s1 + $0x20] sm:$0xff]  ;;  %v185_v8 = vld [vmem:[%s286_s1 + $0x18] sm:$0xff]  ;;  %v184_v10 = vld [vmem:[%s286_s1 + $0x10] sm:$0xff]  ;;  %s130_s6 = sshll.u32 %s220_s5, 4  ;;  %s131_s6 = int_to_ptr.vmem [resolvable:$true] %s130_s6 }
   0x5   :  { %v99_v7 = vsel %vm82_vm0, %v186_v6, 0  ;;  %v96_v9 = vsel %vm82_vm0, %v185_v8, 0  ;;  %v93_v11 = vsel %vm82_vm0, %v184_v10, 0  ;;  %v183_v12 = vld [vmem:[%s286_s1 + $0x8] sm:$0xff]  ;;  %v182_v14 = vld [vmem:[%s286_s1] sm:$0xff]  ;;  %s222_s9 = smov 8  }
   0x6   :  { %v90_v13 = vsel %vm82_vm0, %v183_v12, 0  ;;  %v87_v15 = vsel %vm82_vm0, %v182_v14, 0  ;;  %v181_v16 = vld [vmem:[%s285_s0] sm:$0xff]  ;;  %s221_s0 = smov 128  }
   0x7   :  { %v193_v17 = vld [vmem:[%s287_s2] ss:$0 sm:$0xff] }
   0xb   :  { %111 = vmatpush.bf16.xpose.msra.mxu0 %v105_v3 }
  0x13   :  { %112 = vmatpush.bf16.xpose.msra.mxu0 %v102_v5 }
  0x1b   :  { %113 = vmatpush.bf16.xpose.msra.mxu0 %v99_v7 }
  0x23   :  { %114 = vmatpush.bf16.xpose.msra.mxu0 %v96_v9 }
  0x2b   :  { %115 = vmatpush.bf16.xpose.msra.mxu0 %v93_v11 }
  0x33   :  { %116 = vmatpush.bf16.xpose.msra.mxu0 %v90_v13 }
  0x3b   :  { %117 = vmatpush.bf16.xpose.msra.mxu0 %v87_v15 }
  0x42   :  { %180 = vmatmul.msk.bf16.vlgmr.msra.gmra.mxu0 %vm82_vm0, %v181_v16 }
  0xbf   :  { %v119_v18 = vpop.f32.mrf.mxu0 }
  0xc0   :  { %v120_v19 = vadd.f32 %v193_v17, %v119_v18 }
  0xc2   :  { %124 = vst [vmem:[#allocation2] sm:$0xff] %v120_v19 }
  0xc7   :  { %v121_v20 = vpop.f32.mrf.mxu0 }
  0xc8   :  { %v122_v21 = vadd.f32 %v193_v17, %v121_v20 }
  0xca   :  { %125 = vst [vmem:[#allocation2 + $0x8] sm:$0xff] %v122_v21 }
  0xcb   :  { %138 = dma.vmem_to_hbm [thread:$0]  %s131_s6, 256, %s133_s8, [#allocation3], %s221_s0, %s221_s0, %s222_s9  }
  0xcc   :  { %218 = dma.done.wait [#allocation3], 256  }
  0xcd   :  { %219 = vsyncadd [#allocation3], 4294967040 }
  0xce   :  { %143 = vsyncpa [#allocation3], 1 }

</bundles_post_ra>
